<compile_context>
chip_gen: v5e
topology: v5e:2x2
jax: 0.10.0
libtpu: 0.0.40
codegen_flags: <defaults>
</compile_context>

<pallas_src>
import jax
import jax.numpy as jnp
from jax import lax
from jax.experimental import pallas as pl
from jax.experimental.pallas import tpu as pltpu

_LANE = 128
_SUBLANE = 8


def _round_up(x, m):
    return ((x + m - 1) // m) * m


def critic_head_kernel(x_ref, wb_ref, bb_ref, wv_ref, bv_ref, out_ref):
    # x_ref:  [TB, F_in]          wb_ref: [H, F_in]   (PyTorch [out, in] layout)
    # bb_ref: [1, H]              wv_ref: [N_PAD, H]  (zero-padded rows >= n_heads)
    # bv_ref: [1, N_PAD]          out_ref:[TB, N_PAD] (lane-dense output block)
    x = x_ref[...]

    # base: Linear + ReLU. Contract x's feature dim with wb's in-features dim
    # (i.e. x @ Wb^T) directly on the MXU -- no transposed weight copy needed.
    h = lax.dot_general(
        x, wb_ref[...],
        dimension_numbers=(((1,), (1,)), ((), ())),
        preferred_element_type=jnp.float32,
    )
    h = jnp.maximum(h + bb_ref[...], 0.0)

    # value head: h @ Wv^T, padded out to 128 lanes so the store is unmasked.
    v = lax.dot_general(
        h, wv_ref[...],
        dimension_numbers=(((1,), (1,)), ((), ())),
        preferred_element_type=jnp.float32,
    )
    out_ref[...] = (v + bv_ref[...]).astype(out_ref.dtype)


def critic_head_forward(x, wb, bb, wv, bv, *, tile_b=512):
    """x: [B, F_in]; wb: [H, F_in]; bb: [H]; wv: [n_heads, H]; bv: [n_heads]."""
    B, F_in = x.shape
    H = wb.shape[0]
    n_heads = wv.shape[0]

    # Lane-dense output width (multiple of 128).
    n_pad = max(_LANE, _round_up(n_heads, _LANE))

    # Batch tile: at most tile_b, rounded to sublane granularity; batch padded
    # to a whole number of tiles so every grid step stores a full block.
    TB = max(_SUBLANE, min(tile_b, _round_up(B, _SUBLANE)))
    B_pad = _round_up(B, TB)

    x_p = x if B_pad == B else jnp.pad(x, ((0, B_pad - B), (0, 0)))

    # Weights stay in PyTorch [out, in] layout (no materialized transpose).
    # Value head is zero-padded to n_pad output lanes; extra columns are 0.
    wv_p = jnp.pad(wv, ((0, n_pad - n_heads), (0, 0)))           # [n_pad, H]
    bb2 = bb.reshape(1, H)                                       # [1, H]
    bv_p = jnp.pad(bv, (0, n_pad - n_heads)).reshape(1, n_pad)   # [1, n_pad]

    grid = (B_pad // TB,)
    flops = 2 * B_pad * (F_in * H + H * n_pad)
    bytes_accessed = 4 * (
        x_p.size + wb.size + bb2.size + wv_p.size + bv_p.size + B_pad * n_pad
    )

    out = pl.pallas_call(
        critic_head_kernel,
        out_shape=jax.ShapeDtypeStruct((B_pad, n_pad), jnp.float32),
        grid_spec=pltpu.PrefetchScalarGridSpec(
            num_scalar_prefetch=0,
            grid=grid,
            in_specs=[
                # x streams per batch tile (double-buffered by BlockSpec).
                pl.BlockSpec((TB, F_in), lambda i: (i, 0)),
                # Weights / biases: constant index_map -> resident in VMEM.
                pl.BlockSpec((H, F_in), lambda i: (0, 0)),
                pl.BlockSpec((1, H), lambda i: (0, 0)),
                pl.BlockSpec((n_pad, H), lambda i: (0, 0)),
                pl.BlockSpec((1, n_pad), lambda i: (0, 0)),
            ],
            out_specs=pl.BlockSpec((TB, n_pad), lambda i: (i, 0)),
        ),
        compiler_params=pltpu.CompilerParams(
            dimension_semantics=("parallel",),        # megacore on v7x
            vmem_limit_bytes=32 * 1024 * 1024,        # safe for v7x's 64 MiB VMEM
        ),
        cost_estimate=pl.CostEstimate(
            flops=flops, transcendentals=0, bytes_accessed=bytes_accessed
        ),
    )(x_p, wb, bb2, wv_p, bv_p)

    # Drop batch padding and the lane padding on the head dimension.
    return out[:B, :n_heads]


def init_params(key, in_features, input_dim, n_heads):
    """Deterministic synthetic parameters (PyTorch-Linear-style uniform init)."""
    k1, k2, k3, k4 = jax.random.split(key, 4)
    lim_b = 1.0 / jnp.sqrt(in_features)
    lim_v = 1.0 / jnp.sqrt(input_dim)
    wb = jax.random.uniform(k1, (input_dim, in_features), jnp.float32, -lim_b, lim_b)
    bb = jax.random.uniform(k2, (input_dim,), jnp.float32, -lim_b, lim_b)
    wv = jax.random.uniform(k3, (n_heads, input_dim), jnp.float32, -lim_v, lim_v)
    bv = jax.random.uniform(k4, (n_heads,), jnp.float32, -lim_v, lim_v)
    return wb, bb, wv, bv


if __name__ == "__main__":
    # Small shapes consistent with the module: batch=8, in_features=32,
    # input_dim (base output / value-head input) = 32, n_heads=1.
    B, F_IN, INPUT_DIM, N_HEADS = 8, 32, 32, 1

    key = jax.random.PRNGKey(0)
    kx, kp = jax.random.split(key)
    x = jax.random.normal(kx, (B, F_IN), jnp.float32)
    wb, bb, wv, bv = init_params(kp, F_IN, INPUT_DIM, N_HEADS)

    value = critic_head_forward(x, wb, bb, wv, bv)
    value = jax.block_until_ready(value)

    # Pure-JAX reference check of the same forward.
    h_ref = jnp.maximum(x @ wb.T + bb, 0.0)
    v_ref = h_ref @ wv.T + bv
    assert value.shape == (B, N_HEADS)
    assert jnp.allclose(value, v_ref, atol=1e-5, rtol=1e-5)

    print("KERNEL_OK")
</pallas_src>

<mosaic_0001>
module attributes {stable_mosaic.version = 11 : i64} {
  func.func @critic_head_kernel(%arg0: i32, %arg1: memref<8x32xf32, #tpu.memory_space<vmem>>, %arg2: memref<32x32xf32, #tpu.memory_space<vmem>>, %arg3: memref<1x32xf32, #tpu.memory_space<vmem>>, %arg4: memref<128x32xf32, #tpu.memory_space<vmem>>, %arg5: memref<1x128xf32, #tpu.memory_space<vmem>>, %arg6: memref<8x128xf32, #tpu.memory_space<vmem>>) attributes {dimension_semantics = [#tpu.dimension_semantics<parallel>], iteration_bounds = array<i64: 1>, scalar_prefetch = 0 : i64, scratch_operands = 0 : i64, tpu.core_type = #tpu.core_type<tc>, window_params = [{transform_indices = @transform_0, window_bounds = array<i64: 8, 32>}, {pipeline_mode = #tpu.pipeline_mode<synchronous>, transform_indices = @transform_1, window_bounds = array<i64: 32, 32>}, {pipeline_mode = #tpu.pipeline_mode<synchronous>, transform_indices = @transform_2, window_bounds = array<i64: 1, 32>}, {pipeline_mode = #tpu.pipeline_mode<synchronous>, transform_indices = @transform_3, window_bounds = array<i64: 128, 32>}, {pipeline_mode = #tpu.pipeline_mode<synchronous>, transform_indices = @transform_4, window_bounds = array<i64: 1, 128>}, {transform_indices = @transform_5, window_bounds = array<i64: 8, 128>}]} {
    %c0 = arith.constant 0 : index
    %c0_0 = arith.constant 0 : index
    %0 = vector.load %arg1[%c0, %c0_0] : memref<8x32xf32, #tpu.memory_space<vmem>>, vector<8x32xf32>
    %c0_1 = arith.constant 0 : index
    %c0_2 = arith.constant 0 : index
    %1 = vector.load %arg2[%c0_1, %c0_2] : memref<32x32xf32, #tpu.memory_space<vmem>>, vector<32x32xf32>
    %cst = arith.constant dense<0.000000e+00> : vector<8x32xf32>
    %2 = tpu.matmul %0, %1, %cst {dimension_numbers = #tpu.dot_dimension_numbers<[1], [1], [0], [0], [0, 0, 1, 0], [], []>} : vector<8x32xf32>, vector<32x32xf32>, vector<8x32xf32> -> vector<8x32xf32>
    %c0_3 = arith.constant 0 : index
    %c0_4 = arith.constant 0 : index
    %3 = vector.load %arg3[%c0_3, %c0_4] : memref<1x32xf32, #tpu.memory_space<vmem>>, vector<1x32xf32>
    %4 = vector.broadcast %3 : vector<1x32xf32> to vector<8x32xf32>
    %5 = arith.addf %2, %4 : vector<8x32xf32>
    %cst_5 = arith.constant 0.000000e+00 : f32
    %6 = vector.broadcast %cst_5 : f32 to vector<8x32xf32>
    %7 = arith.maximumf %5, %6 : vector<8x32xf32>
    %c0_6 = arith.constant 0 : index
    %c0_7 = arith.constant 0 : index
    %8 = vector.load %arg4[%c0_6, %c0_7] : memref<128x32xf32, #tpu.memory_space<vmem>>, vector<128x32xf32>
    %cst_8 = arith.constant dense<0.000000e+00> : vector<8x128xf32>
    %9 = tpu.matmul %7, %8, %cst_8 {dimension_numbers = #tpu.dot_dimension_numbers<[1], [1], [0], [0], [0, 0, 1, 0], [], []>} : vector<8x32xf32>, vector<128x32xf32>, vector<8x128xf32> -> vector<8x128xf32>
    %c0_9 = arith.constant 0 : index
    %c0_10 = arith.constant 0 : index
    %10 = vector.load %arg5[%c0_9, %c0_10] : memref<1x128xf32, #tpu.memory_space<vmem>>, vector<1x128xf32>
    %11 = vector.broadcast %10 : vector<1x128xf32> to vector<8x128xf32>
    %12 = arith.addf %9, %11 : vector<8x128xf32>
    %c0_11 = arith.constant 0 : index
    %c0_12 = arith.constant 0 : index
    %13 = vector.load %arg6[%c0_11, %c0_12] : memref<8x128xf32, #tpu.memory_space<vmem>>, vector<8x128xf32>
    tpu.vector_store %arg6[%c0_11, %c0_12], %12 {strides = array<i32>} : memref<8x128xf32, #tpu.memory_space<vmem>>, vector<8x128xf32>,
    return
  }
  func.func @transform_0(%arg0: i32) -> (i32, i32) {
    %c0_i32 = arith.constant 0 : i32
    %c0_i32_0 = arith.constant 0 : i32
    return %arg0, %c0_i32 : i32, i32
  }
  func.func @transform_1(%arg0: i32) -> (i32, i32) {
    %c0_i32 = arith.constant 0 : i32
    %c0_i32_0 = arith.constant 0 : i32
    %c0_i32_1 = arith.constant 0 : i32
    return %c0_i32, %c0_i32_0 : i32, i32
  }
  func.func @transform_2(%arg0: i32) -> (i32, i32) {
    %c0_i32 = arith.constant 0 : i32
    %c0_i32_0 = arith.constant 0 : i32
    %c0_i32_1 = arith.constant 0 : i32
    return %c0_i32, %c0_i32_0 : i32, i32
  }
  func.func @transform_3(%arg0: i32) -> (i32, i32) {
    %c0_i32 = arith.constant 0 : i32
    %c0_i32_0 = arith.constant 0 : i32
    %c0_i32_1 = arith.constant 0 : i32
    return %c0_i32, %c0_i32_0 : i32, i32
  }
  func.func @transform_4(%arg0: i32) -> (i32, i32) {
    %c0_i32 = arith.constant 0 : i32
    %c0_i32_0 = arith.constant 0 : i32
    %c0_i32_1 = arith.constant 0 : i32
    return %c0_i32, %c0_i32_0 : i32, i32
  }
  func.func @transform_5(%arg0: i32) -> (i32, i32) {
    %c0_i32 = arith.constant 0 : i32
    %c0_i32_0 = arith.constant 0 : i32
    return %arg0, %c0_i32 : i32, i32
  }
}

</mosaic_0001>

<bundles_post_ra>
// kernel: tpu_custom_call.1
= control target key start
LH: loop header
LB: loop body
LE: loop exit
PB: predicated region body
PF: predicated region fallthrough
CT: control target
= control target key end

     0   :  { %vm30_vm0 = vcmask 261120   ;;  %s351_s0 = inlined_call_operand.vmem [shape: f32[8,32], index: 0, kind: input, shape index: {}]   ;;  %s352_s1 = inlined_call_operand.vmem [shape: f32[32,32], index: 1, kind: input, shape index: {}]   ;;  %s353_s2 = inlined_call_operand.vmem [shape: f32[1,32], index: 2, kind: input, shape index: {}]   ;;  %s354_s3 = inlined_call_operand.vmem [shape: f32[128,32], index: 3, kind: input, shape index: {}]   ;;  %s355_s4 = inlined_call_operand.vmem [shape: f32[1,128], index: 4, kind: input, shape index: {}]   ;;  %s356_s5 = inlined_call_operand.hbm [shape: f32[8,128], index: 5, kind: output, shape index: {}]  }
   0x1   :  { %v25_v0 = vld [vmem:[%s352_s1 + $0x18] sm:$0xff]  ;;  %v24_v2 = vld [vmem:[%s352_s1 + $0x10] sm:$0xff] }
   0x2   :  { %175 = vmatpush.xpose.msk.msra.mxu0 %vm30_vm0, %v25_v0  ;;  %v82_v1 = vld [vmem:[%s354_s3 + $0x78] sm:$0xff]  ;;  %v81_v3 = vld [vmem:[%s354_s3 + $0x70] sm:$0xff] }
   0x3   :  { %180 = vmatpush.xpose.msk.msra.mxu1 %vm30_vm0, %v82_v1 }
   0x6   :  { %176 = vmatpush.xpose.msk.msra.mxu0 %vm30_vm0, %v24_v2 }
   0x7   :  { %10 = vsyncpa [#allocation3], 0  ;;  %v23_v4 = vld [vmem:[%s352_s1 + $0x8] sm:$0xff]  ;;  %181 = vmatpush.xpose.msk.msra.mxu1 %vm30_vm0, %v81_v3  ;;  %v22_v6 = vld [vmem:[%s352_s1] sm:$0xff]  ;;  %s226_s12 = smov [#allocation2]  }
   0x8   :  { %v80_v5 = vld [vmem:[%s354_s3 + $0x68] sm:$0xff]  ;;  %v79_v7 = vld [vmem:[%s354_s3 + $0x60] sm:$0xff]  ;;  %v78_v9 = vld [vmem:[%s354_s3 + $0x58] sm:$0xff]  ;;  %s164_s1 = sshll.u32 %s226_s12, 4  ;;  %s165_s1 = int_to_ptr.vmem [resolvable:$true] %s164_s1 }
   0x9   :  { %v21_v8 = vld [vmem:[%s351_s0] sm:$0xff]  ;;  %v77_v10 = vld [vmem:[%s354_s3 + $0x50] sm:$0xff]  ;;  %v76_v11 = vld [vmem:[%s354_s3 + $0x48] sm:$0xff] }
   0xa   :  { %177 = vmatpush.xpose.msk.msra.mxu0 %vm30_vm0, %v23_v4  ;;  %v75_v12 = vld [vmem:[%s354_s3 + $0x40] sm:$0xff]  ;;  %v74_v13 = vld [vmem:[%s354_s3 + $0x38] sm:$0xff]  ;;  %v73_v14 = vld [vmem:[%s354_s3 + $0x30] sm:$0xff] }
   0xb   :  { %182 = vmatpush.xpose.msk.msra.mxu1 %vm30_vm0, %v80_v5  ;;  %v72_v15 = vld [vmem:[%s354_s3 + $0x28] sm:$0xff]  ;;  %v71_v16 = vld [vmem:[%s354_s3 + $0x20] sm:$0xff]  ;;  %v70_v17 = vld [vmem:[%s354_s3 + $0x18] sm:$0xff] }
   0xc   :  { %v69_v18 = vld [vmem:[%s354_s3 + $0x10] sm:$0xff]  ;;  %v68_v19 = vld [vmem:[%s354_s3 + $0x8] sm:$0xff]  ;;  %v67_v20 = vld [vmem:[%s354_s3] sm:$0xff]  ;;  %s166_s3 = sshll.u32 %s356_s5, 4  ;;  %s167_s3 = int_to_ptr.hbm [resolvable:$true] %s166_s3 }
   0xd   :  { %v198_v21 = vld [vmem:[%s353_s2] ss:$0 sm:$0xff] }
   0xe   :  { %178 = vmatpush.xpose.msk.msra.mxu0 %vm30_vm0, %v22_v6  ;;  %v199_v25 = vld [vmem:[%s355_s4] ss:$0 sm:$0xff] }
   0xf   :  { %183 = vmatpush.xpose.msk.msra.mxu1 %vm30_vm0, %v79_v7 }
  0x11   :  { %179 = vmatmul.msk.f32.vlgmr.msra.gmra.mxu0 %vm30_vm0, %v21_v8 }
  0x13   :  { %184 = vmatpush.xpose.msk.msra.mxu1 %vm30_vm0, %v78_v9 }
  0x17   :  { %185 = vmatpush.xpose.msk.msra.mxu1 %vm30_vm0, %v77_v10 }
  0x1b   :  { %186 = vmatpush.xpose.msk.msra.mxu1 %vm30_vm0, %v76_v11 }
  0x1f   :  { %187 = vmatpush.xpose.msk.msra.mxu1 %vm30_vm0, %v75_v12 }
  0x23   :  { %188 = vmatpush.xpose.msk.msra.mxu1 %vm30_vm0, %v74_v13 }
  0x27   :  { %189 = vmatpush.xpose.msk.msra.mxu1 %vm30_vm0, %v73_v14 }
  0x2b   :  { %190 = vmatpush.xpose.msk.msra.mxu1 %vm30_vm0, %v72_v15 }
  0x2f   :  { %191 = vmatpush.xpose.msk.msra.mxu1 %vm30_vm0, %v71_v16 }
  0x33   :  { %192 = vmatpush.xpose.msk.msra.mxu1 %vm30_vm0, %v70_v17 }
  0x37   :  { %193 = vmatpush.xpose.msk.msra.mxu1 %vm30_vm0, %v69_v18 }
  0x3b   :  { %194 = vmatpush.xpose.msk.msra.mxu1 %vm30_vm0, %v68_v19 }
  0x3f   :  { %195 = vmatpush.xpose.msk.msra.mxu1 %vm30_vm0, %v67_v20 }
  0x8e   :  { %v63_v22 = vpop.f32.mrf.mxu0 }
  0x8f   :  { %v64_v23 = vadd.f32 %v198_v21, %v63_v22 }
  0x91   :  { %v66_v24 = vmax.f32 %v64_v23, 0.0 }
  0x93   :  { %196 = vmatmul.msk.f32.vlgmr.msra.gmra.mxu1 %vm30_vm0, %v66_v24 }
 0x110   :  { %v155_v26 = vpop.f32.mrf.mxu1 }
 0x111   :  { %v156_v27 = vadd.f32 %v199_v25, %v155_v26 }
 0x113   :  { %158 = vst [vmem:[#allocation2] sm:$0xff] %v156_v27 }
 0x114   :  { %169 = dma.vmem_to_hbm [thread:$0]  %s165_s1, 128, %s167_s3, [#allocation3]  }
 0x115   :  { %224 = dma.done.wait [#allocation3], 128  }
 0x116   :  { %225 = vsyncadd [#allocation3], 4294967168 }
 0x117   :  { %174 = vsyncpa [#allocation3], 1 }

</bundles_post_ra>
